<compile_context>
chip_gen: v7x
topology: tpu7x:2x2x1
jax: 0.10.0
libtpu: 0.0.40
codegen_flags: <defaults>
</compile_context>

<pallas_src>
import math
from functools import partial

import jax
import jax.numpy as jnp
from jax.experimental import pallas as pl
from jax.experimental.pallas import tpu as pltpu

_INV_SQRT2 = 1.0 / math.sqrt(2.0)
_LANES = 128


def _sublane_multiple(dtype) -> int:
    # f32/i32 -> 8, bf16/f16 -> 16, int8/fp8 -> 32
    itemsize = jnp.dtype(dtype).itemsize
    return max(8, 32 // max(int(itemsize), 1))


def _gelu_kernel(x_ref, o_ref):
    # Exact (erf-based) GELU, matching torch.nn.functional.gelu default.
    x = x_ref[...].astype(jnp.float32)
    y = 0.5 * x * (1.0 + jax.lax.erf(x * _INV_SQRT2))
    o_ref[...] = y.astype(o_ref.dtype)


@partial(jax.jit, static_argnames=("block_rows",))
def module_wrapper_gelu(x: jax.Array, *, block_rows: int = 4096) -> jax.Array:
    """Forward of ModuleWrapperClass(fcn=F.gelu): elementwise exact GELU."""
    orig_shape = x.shape
    orig_dtype = x.dtype
    n = x.size

    sub = _sublane_multiple(orig_dtype)
    block_rows = max(sub, (block_rows // sub) * sub)

    # --- glue: flatten to a lane-dense 2D slab -------------------------------
    flat = jnp.ravel(x)                      # free (contiguous) under jit
    lane_pad = (-n) % _LANES                 # only pad the <128-elem remainder
    if lane_pad:
        flat = jnp.pad(flat, (0, lane_pad))
    rows = flat.size // _LANES
    slab = flat.reshape(rows, _LANES)

    # Row tile: as large as block_rows, sublane-aligned, but capped so the grid
    # has >=2 blocks whenever possible (keeps both v7x TensorCores busy).
    half = -(-rows // 2)
    half_aligned = -(-half // sub) * sub
    tr = max(sub, min(block_rows, half_aligned))
    grid = (pl.cdiv(rows, tr),)              # ragged last block handled by Pallas

    bytes_per_elem = jnp.dtype(orig_dtype).itemsize
    cost = pl.CostEstimate(
        flops=8 * n,
        transcendentals=n,
        bytes_accessed=2 * n * bytes_per_elem,
    )

    out_slab = pl.pallas_call(
        _gelu_kernel,
        out_shape=jax.ShapeDtypeStruct((rows, _LANES), orig_dtype),
        grid_spec=pltpu.PrefetchScalarGridSpec(
            num_scalar_prefetch=0,
            grid=grid,
            in_specs=[pl.BlockSpec((tr, _LANES), lambda i: (i, 0))],
            out_specs=pl.BlockSpec((tr, _LANES), lambda i: (i, 0)),
        ),
        compiler_params=pltpu.CompilerParams(
            dimension_semantics=("parallel",),
        ),
        cost_estimate=cost,
    )(slab)

    out_flat = out_slab.reshape(-1)
    if lane_pad:
        out_flat = out_flat[:n]
    return out_flat.reshape(orig_shape)


if __name__ == "__main__":
    key = jax.random.PRNGKey(0)

    # Input consistent with the module's forward: NCHW [B=2, C=4, H=16, W=16]
    x = jax.random.normal(key, (2, 4, 16, 16), dtype=jnp.float32)
    y = module_wrapper_gelu(x)
    jax.block_until_ready(y)
    y_ref = jax.nn.gelu(x, approximate=False)
    assert y.shape == x.shape and y.dtype == x.dtype
    assert jnp.max(jnp.abs(y - y_ref)) < 1e-5

    # Ragged shape (n not a multiple of 128, rows not a multiple of the tile):
    # exercises lane padding + cdiv grid with a masked final block.
    x2 = jax.random.normal(jax.random.PRNGKey(1), (3, 5, 7, 11), dtype=jnp.float32)
    y2 = module_wrapper_gelu(x2)
    jax.block_until_ready(y2)
    assert jnp.max(jnp.abs(y2 - jax.nn.gelu(x2, approximate=False))) < 1e-5

    # bf16 path: exercises the dtype-dependent (16,128) sublane multiple.
    x3 = jax.random.normal(jax.random.PRNGKey(2), (4, 8, 16, 16)).astype(jnp.bfloat16)
    y3 = module_wrapper_gelu(x3)
    jax.block_until_ready(y3)
    y3_ref = jax.nn.gelu(x3.astype(jnp.float32), approximate=False).astype(jnp.bfloat16)
    assert y3.dtype == jnp.bfloat16
    assert jnp.max(jnp.abs(y3.astype(jnp.float32) - y3_ref.astype(jnp.float32))) < 2e-2

    print("KERNEL_OK")
</pallas_src>

<mosaic_0001>
module attributes {stable_mosaic.version = 11 : i64} {
  func.func @_gelu_kernel(%arg0: i32, %arg1: memref<8x128xf32, #tpu.memory_space<vmem>>, %arg2: memref<8x128xf32, #tpu.memory_space<vmem>>) attributes {dimension_semantics = [#tpu.dimension_semantics<parallel>], iteration_bounds = array<i64: 2>, scalar_prefetch = 0 : i64, scratch_operands = 0 : i64, tpu.core_type = #tpu.core_type<tc>, window_params = [{transform_indices = @transform_0, window_bounds = array<i64: 8, 128>}, {transform_indices = @transform_1, window_bounds = array<i64: 8, 128>}]} {
    %c0 = arith.constant 0 : index
    %c0_0 = arith.constant 0 : index
    %0 = vector.load %arg1[%c0, %c0_0] : memref<8x128xf32, #tpu.memory_space<vmem>>, vector<8x128xf32>
    %cst = arith.constant 5.000000e-01 : f32
    %1 = vector.broadcast %cst : f32 to vector<8x128xf32>
    %2 = arith.mulf %1, %0 : vector<8x128xf32>
    %cst_1 = arith.constant 0.707106769 : f32
    %3 = vector.broadcast %cst_1 : f32 to vector<8x128xf32>
    %4 = arith.mulf %0, %3 : vector<8x128xf32>
    %5 = math.erf %4 : vector<8x128xf32>
    %cst_2 = arith.constant 1.000000e+00 : f32
    %6 = vector.broadcast %cst_2 : f32 to vector<8x128xf32>
    %7 = arith.addf %6, %5 : vector<8x128xf32>
    %8 = arith.mulf %2, %7 : vector<8x128xf32>
    %c0_3 = arith.constant 0 : index
    %c0_4 = arith.constant 0 : index
    %9 = vector.load %arg2[%c0_3, %c0_4] : memref<8x128xf32, #tpu.memory_space<vmem>>, vector<8x128xf32>
    tpu.vector_store %arg2[%c0_3, %c0_4], %8 {strides = array<i32>} : memref<8x128xf32, #tpu.memory_space<vmem>>, vector<8x128xf32>,
    return
  }
  func.func @transform_0(%arg0: i32) -> (i32, i32) {
    %c0_i32 = arith.constant 0 : i32
    %c0_i32_0 = arith.constant 0 : i32
    return %arg0, %c0_i32 : i32, i32
  }
  func.func @transform_1(%arg0: i32) -> (i32, i32) {
    %c0_i32 = arith.constant 0 : i32
    %c0_i32_0 = arith.constant 0 : i32
    return %arg0, %c0_i32 : i32, i32
  }
}

</mosaic_0001>

<bundles_post_ra>
// kernel: module_wrapper_gelu.1
= control target key start
LH: loop header
LB: loop body
LE: loop exit
PB: predicated region body
PF: predicated region fallthrough
CT: control target
= control target key end

     0   :  { %s195_s6 = smov 0   ;;  %s215_s0 = inlined_call_operand.vmem [shape: f32[16,128], index: 0, kind: input, shape index: {}]   ;;  %s216_s1 = inlined_call_operand.vmem [shape: f32[16,128], index: 1, kind: output, shape index: {}]  }
   0x1 LB: > { %s172_s7 = sadd.s32 4294967295, %s197_s6   ;;  %p176_p0 = scmp.ge.s32.totalorder %s197_s6, 1  ;;  %s197_s6 = sphi %s195_s6, %s11_s6  }
   0x2   : > { %p86_p1 = scmp.lt.s32.totalorder %s197_s6, 3 }
   0x4   : > { %p87_p2 = pnand %p176_p0, %p86_p1 }
   0x5   : > { %p104_p3 = scmp.lt.s32.totalorder (!%p87_p2), %s172_s7, 1 }
   0x6   : > { %90 = sbr.rel (%p87_p2) target bundleno = 35 (0x23), region = 24 }
   0xd   : > { %s218_s7 = smov (!%p104_p3, %s172_s7), 1 }
   0xe   : > { %s177_s8 = sshll.u32 %s218_s7, 3 }
   0xf   : > { %s107_s11 = scalar_lea.vmem %s215_s0, %s177_s8  ;;  %s111_s14 = scalar_lea.vmem %s216_s1, %s177_s8 }
  0x10   : > { %v112_v0 = vld [vmem:[%s107_s11] sm:$0xff] }
  0x11   : > { %v114_v1 = vmul.f32 0.70710677, %v112_v0  ;;  %v113_v2 = vmul.f32 0.5, %v112_v0 }
  0x13   : > { %189 = verf.f32 %v114_v1 }
  0x1d   : > { %v190_v3 = vpop.eup %189 }
  0x1e   : > { %v116_v4 = vadd.f32 1.0, %v190_v3 }
  0x20   : > { %v117_v5 = vmul.f32 %v116_v4, %v113_v2 }
  0x22   : > { %118 = vst [vmem:[%s111_s14] sm:$0xff] %v117_v5 }
  0x23 PF: > { %s11_s6 = sadd.s32 1, %s197_s6  }
  0x24   : > { %p8_p4 = scmp.ge.s32.totalorder %s11_s6, 4  }
  0x26   :  { %10 = sbr.rel (!%p8_p4) target bundleno = 1 (0x1), region = 54 }

</bundles_post_ra>
